<compile_context>
chip_gen: v7x
topology: tpu7x:2x2x1
jax: 0.10.0
libtpu: 0.0.40
codegen_flags: <defaults>
</compile_context>

<pallas_src>
import jax
import jax.numpy as jnp
from jax.experimental import pallas as pl
from jax.experimental.pallas import tpu as pltpu


def _round_up(x, m):
    return (x + m - 1) // m * m


def _physical_vmem_bytes():
    """Per-core physical VMEM (128 MiB on v5e/v6e, 64 MiB on v7x); conservative fallback."""
    try:
        info = pltpu.get_tpu_info()
        for name in ("vmem_capacity_bytes", "vmem_bytes", "vmem_size_bytes"):
            v = getattr(info, name, None)
            if v:
                return int(v)
    except Exception:
        pass
    return 64 << 20


def _vmem_bytes(tile_rows, tk, hidden_p, bx, bw, wbuf):
    """Honest VMEM estimate for one grid step (pipelined buffers + scratch + intermediate)."""
    return (2 * tile_rows * hidden_p * bx            # x tile (double-buffered)
            + wbuf * (hidden_p + 1) * tk * bw        # W1 column chunk + b1 chunk
            + wbuf * (tk + 1) * hidden_p * bw        # W2 row chunk + b2
            + 2 * tile_rows * hidden_p * bx          # output tile (double-buffered)
            + tile_rows * hidden_p * 4               # f32 accumulator scratch
            + tile_rows * tk * 4)                    # f32 intermediate h between the dots


def _ffn_kernel(x_ref, w1_ref, b1_ref, w2_ref, b2_ref, o_ref, acc_ref):
    # x_ref:  (tile_rows, Hp)
    # w1_ref: (Hp, tk)     b1_ref: (1, tk)
    # w2_ref: (tk, Hp)     b2_ref: (1, Hp)
    # o_ref:  (tile_rows, Hp)
    # acc_ref: f32 (tile_rows, Hp) scratch, resident across the k (reduction) axis
    k = pl.program_id(1)

    @pl.when(k == 0)
    def _():
        acc_ref[...] = jnp.zeros_like(acc_ref)

    # linear1 partial (columns k*tk : (k+1)*tk of the 4H intermediate) + bias + ReLU.
    # Each intermediate column lives entirely in one k chunk, so per-chunk bias+ReLU is exact.
    h = jnp.dot(x_ref[...], w1_ref[...], preferred_element_type=jnp.float32)
    h = jnp.maximum(h + b1_ref[...], 0.0)

    # dropout: inference-mode identity (PyTorch nn.Dropout in eval() is a no-op).
    # TODO(synk): training-mode dropout (pltpu.prng_random_bits mask + 1/(1-p) scale) cannot
    #             reproduce torch's RNG stream, so it is left as identity here.

    # linear2 partial product, accumulated in f32.
    acc_ref[...] += jnp.dot(h.astype(w2_ref.dtype), w2_ref[...],
                            preferred_element_type=jnp.float32)

    @pl.when(k == pl.num_programs(1) - 1)
    def _():
        # bias2 added exactly once, in the finalize branch.
        o_ref[...] = (acc_ref[...] + b2_ref[...]).astype(o_ref.dtype)


def feed_forward(x, w1, b1, w2, b2, *, tile_rows=512, tk=1024,
                 weight_buffers=2, vmem_limit_bytes=None):
    """x: [batch, seq, hidden]; w1: [H, 4H]; b1: [4H]; w2: [4H, H]; b2: [H]."""
    batch, seq, hidden = x.shape
    h4 = w1.shape[1]
    assert w1.shape == (hidden, h4)
    assert w2.shape == (h4, hidden)
    assert b1.shape == (h4,) and b2.shape == (hidden,)

    rows = batch * seq
    x2d = x.reshape(rows, hidden)

    bx = jnp.dtype(x.dtype).itemsize
    bw = jnp.dtype(w1.dtype).itemsize
    wbuf = max(2, int(weight_buffers))

    # ---- generation-aware VMEM budget ---------------------------------------------
    phys = _physical_vmem_bytes()                      # 128 MiB v5e/v6e, 64 MiB v7x
    usable = phys - max(12 << 20, phys // 8)           # reserve compiler internal scratch
                                                       # (~112 MiB v5e/v6e, ~52 MiB v7x)

    # ---- tile / padding geometry ----------------------------------------------------
    hidden_p = _round_up(hidden, 256)                  # 256-aligned: full 2x256^2 MXU passes
    tile_rows = _round_up(max(16, min(tile_rows, _round_up(rows, 16))), 16)
    tk = _round_up(max(256, min(tk, _round_up(h4, 256))), 256)

    # Shrink k chunk, then rows, until the config honestly fits the per-core VMEM budget.
    while _vmem_bytes(tile_rows, tk, hidden_p, bx, bw, wbuf) > usable and tk > 256:
        tk = max(256, tk // 2)
    while _vmem_bytes(tile_rows, tk, hidden_p, bx, bw, wbuf) > usable and tile_rows > 64:
        tile_rows = _round_up(max(64, tile_rows // 2), 16)

    # v7x megacore: give the "parallel" row axis >= 2 tiles so both TensorCores get work,
    # but only when each half still amortizes the streamed weights (>= 256 rows/tile).
    if rows <= tile_rows and rows >= 512:
        tile_rows = _round_up(-(-rows // 2), 16)

    rows_p = _round_up(rows, tile_rows)
    h4_p = _round_up(h4, tk)
    n_row_tiles = rows_p // tile_rows
    n_k = h4_p // tk

    # ---- zero padding (guarded: no-op for aligned shapes; sliced off at the end) ----
    x_p = x2d
    if rows_p != rows or hidden_p != hidden:
        x_p = jnp.pad(x2d, ((0, rows_p - rows), (0, hidden_p - hidden)))
    w1_p = w1 if (hidden_p == hidden and h4_p == h4) else \
        jnp.pad(w1, ((0, hidden_p - hidden), (0, h4_p - h4)))
    w2_p = w2 if (hidden_p == hidden and h4_p == h4) else \
        jnp.pad(w2, ((0, h4_p - h4), (0, hidden_p - hidden)))
    b1_p = (b1 if h4_p == h4 else jnp.pad(b1, (0, h4_p - h4))).reshape(1, h4_p)
    b2_p = (b2 if hidden_p == hidden else jnp.pad(b2, (0, hidden_p - hidden))).reshape(1, hidden_p)

    if vmem_limit_bytes is None:
        est = _vmem_bytes(tile_rows, tk, hidden_p, bx, bw, wbuf) + (4 << 20)
        vmem_limit_bytes = int(min(max(est, 32 << 20), usable))

    # Advisory cost hint so XLA schedules surrounding ops sensibly around the custom call.
    cost = pl.CostEstimate(
        flops=4 * rows * hidden * h4,                  # two matmuls, 2 flops/MAC
        transcendentals=0,
        bytes_accessed=int(rows * hidden * bx * 2
                           + (hidden * h4 + h4 * hidden + h4 + hidden) * bw),
    )

    def _wspec(shape, index_map):
        # Optional deeper buffering of the streamed weight chunks (use only with VMEM headroom).
        if wbuf > 2:
            return pl.BlockSpec(shape, index_map, pipeline_mode=pl.Buffered(wbuf))
        return pl.BlockSpec(shape, index_map)

    out_p = pl.pallas_call(
        _ffn_kernel,
        out_shape=jax.ShapeDtypeStruct((rows_p, hidden_p), x.dtype),
        grid_spec=pltpu.PrefetchScalarGridSpec(
            num_scalar_prefetch=0,
            grid=(n_row_tiles, n_k),                                     # reduction axis last
            in_specs=[
                pl.BlockSpec((tile_rows, hidden_p), lambda i, k: (i, 0)),  # x rows
                _wspec((hidden_p, tk), lambda i, k: (0, k)),               # W1 column chunk
                pl.BlockSpec((1, tk), lambda i, k: (0, k)),                # b1 chunk
                _wspec((tk, hidden_p), lambda i, k: (k, 0)),               # W2 row chunk
                pl.BlockSpec((1, hidden_p), lambda i, k: (0, 0)),          # b2
            ],
            out_specs=pl.BlockSpec((tile_rows, hidden_p), lambda i, k: (i, 0)),
            scratch_shapes=[pltpu.VMEM((tile_rows, hidden_p), jnp.float32)],
        ),
        compiler_params=pltpu.CompilerParams(
            dimension_semantics=("parallel", "arbitrary"),
            vmem_limit_bytes=vmem_limit_bytes,
        ),
        cost_estimate=cost,
    )(x_p, w1_p, b1_p, w2_p, b2_p)

    out = out_p
    if rows_p != rows or hidden_p != hidden:
        out = out_p[:rows, :hidden]
    return out.reshape(batch, seq, hidden)


def init_params(key, hidden_size, dtype=jnp.bfloat16):
    """Deterministic init matching nn.Linear shapes; weights stored transposed, bf16 by default."""
    k1, k2, k3, k4 = jax.random.split(key, 4)
    h, h4 = hidden_size, 4 * hidden_size
    # PyTorch nn.Linear default init: U(-1/sqrt(fan_in), 1/sqrt(fan_in))
    bound1 = 1.0 / (h ** 0.5)
    bound2 = 1.0 / (h4 ** 0.5)
    w1 = jax.random.uniform(k1, (h, h4), jnp.float32, minval=-bound1, maxval=bound1).astype(dtype)
    b1 = jax.random.uniform(k2, (h4,), jnp.float32, minval=-bound1, maxval=bound1).astype(dtype)
    w2 = jax.random.uniform(k3, (h4, h), jnp.float32, minval=-bound2, maxval=bound2).astype(dtype)
    b2 = jax.random.uniform(k4, (h,), jnp.float32, minval=-bound2, maxval=bound2).astype(dtype)
    return w1, b1, w2, b2


if __name__ == "__main__":
    batch, seq, hidden = 2, 8, 32  # small shapes consistent with a transformer FFN
    key = jax.random.PRNGKey(0)
    kx, kp = jax.random.split(key)

    # bf16 operands (full MXU rate, half the HBM traffic), f32 accumulation inside the kernel.
    x = jax.random.normal(kx, (batch, seq, hidden), jnp.float32).astype(jnp.bfloat16)
    w1, b1, w2, b2 = init_params(kp, hidden, dtype=jnp.bfloat16)

    out = feed_forward(x, w1, b1, w2, b2)
    out = jax.block_until_ready(out)

    # f32 reference from the same bf16 operands; the extra bf16 round on the ReLU output
    # mirrors the in-kernel cast of `h` before the second matmul.
    xf = x.astype(jnp.float32).reshape(-1, hidden)
    h_ref = jnp.maximum(xf @ w1.astype(jnp.float32) + b1.astype(jnp.float32), 0.0)
    h_ref = h_ref.astype(jnp.bfloat16).astype(jnp.float32)
    ref = (h_ref @ w2.astype(jnp.float32) + b2.astype(jnp.float32)).reshape(batch, seq, hidden)

    assert out.shape == (batch, seq, hidden)
    assert out.dtype == jnp.bfloat16
    max_err = float(jnp.max(jnp.abs(out.astype(jnp.float32) - ref)))
    assert max_err < 3e-2, f"max abs err {max_err}"

    print("KERNEL_OK")
</pallas_src>

<mosaic_0001>
module attributes {stable_mosaic.version = 11 : i64} {
  func.func @_ffn_kernel(%arg0: i32, %arg1: i32, %arg2: memref<16x256xbf16, #tpu.memory_space<vmem>>, %arg3: memref<256x256xbf16, #tpu.memory_space<vmem>>, %arg4: memref<1x256xbf16, #tpu.memory_space<vmem>>, %arg5: memref<256x256xbf16, #tpu.memory_space<vmem>>, %arg6: memref<1x256xbf16, #tpu.memory_space<vmem>>, %arg7: memref<16x256xbf16, #tpu.memory_space<vmem>>, %arg8: memref<16x256xf32, #tpu.memory_space<vmem>>) attributes {dimension_semantics = [#tpu.dimension_semantics<parallel>, #tpu.dimension_semantics<arbitrary>], iteration_bounds = array<i64: 1, 1>, scalar_prefetch = 0 : i64, scratch_operands = 1 : i64, tpu.core_type = #tpu.core_type<tc>, window_params = [{transform_indices = @transform_0, window_bounds = array<i64: 16, 256>}, {transform_indices = @transform_1, window_bounds = array<i64: 256, 256>}, {transform_indices = @transform_2, window_bounds = array<i64: 1, 256>}, {transform_indices = @transform_3, window_bounds = array<i64: 256, 256>}, {pipeline_mode = #tpu.pipeline_mode<synchronous>, transform_indices = @transform_4, window_bounds = array<i64: 1, 256>}, {transform_indices = @transform_5, window_bounds = array<i64: 16, 256>}]} {
    %c0_i32 = arith.constant 0 : i32
    %0 = arith.cmpi eq, %arg1, %c0_i32 : i32
    %1 = arith.extui %0 : i1 to i32
    %c0_i32_0 = arith.constant 0 : i32
    %2 = arith.cmpi ne, %1, %c0_i32_0 : i32
    scf.if %2 {
      %cst_16 = arith.constant 0.000000e+00 : f32
      %21 = vector.broadcast %cst_16 : f32 to vector<16x256xf32>
      %c0_17 = arith.constant 0 : index
      %c0_18 = arith.constant 0 : index
      %22 = vector.load %arg8[%c0_17, %c0_18] : memref<16x256xf32, #tpu.memory_space<vmem>>, vector<16x256xf32>
      tpu.vector_store %arg8[%c0_17, %c0_18], %21 {strides = array<i32>} : memref<16x256xf32, #tpu.memory_space<vmem>>, vector<16x256xf32>,
    } else {
    }
    %c0 = arith.constant 0 : index
    %c0_1 = arith.constant 0 : index
    %3 = vector.load %arg2[%c0, %c0_1] : memref<16x256xbf16, #tpu.memory_space<vmem>>, vector<16x256xbf16>
    %c0_2 = arith.constant 0 : index
    %c0_3 = arith.constant 0 : index
    %4 = vector.load %arg3[%c0_2, %c0_3] : memref<256x256xbf16, #tpu.memory_space<vmem>>, vector<256x256xbf16>
    %cst = arith.constant dense<0.000000e+00> : vector<16x256xf32>
    %5 = tpu.matmul %3, %4, %cst {dimension_numbers = #tpu.dot_dimension_numbers<[1], [0], [0], [1], [0, 0, 1, 1], [], []>} : vector<16x256xbf16>, vector<256x256xbf16>, vector<16x256xf32> -> vector<16x256xf32>
    %c0_4 = arith.constant 0 : index
    %c0_5 = arith.constant 0 : index
    %6 = vector.load %arg4[%c0_4, %c0_5] : memref<1x256xbf16, #tpu.memory_space<vmem>>, vector<1x256xbf16>
    %7 = arith.extf %6 : vector<1x256xbf16> to vector<1x256xf32>
    %8 = vector.broadcast %7 : vector<1x256xf32> to vector<16x256xf32>
    %9 = arith.addf %5, %8 : vector<16x256xf32>
    %cst_6 = arith.constant 0.000000e+00 : f32
    %10 = vector.broadcast %cst_6 : f32 to vector<16x256xf32>
    %11 = arith.maximumf %9, %10 : vector<16x256xf32>
    %c0_7 = arith.constant 0 : index
    %c0_8 = arith.constant 0 : index
    %12 = vector.load %arg8[%c0_7, %c0_8] : memref<16x256xf32, #tpu.memory_space<vmem>>, vector<16x256xf32>
    %13 = arith.truncf %11 : vector<16x256xf32> to vector<16x256xbf16>
    %c0_9 = arith.constant 0 : index
    %c0_10 = arith.constant 0 : index
    %14 = vector.load %arg5[%c0_9, %c0_10] : memref<256x256xbf16, #tpu.memory_space<vmem>>, vector<256x256xbf16>
    %cst_11 = arith.constant dense<0.000000e+00> : vector<16x256xf32>
    %15 = tpu.matmul %13, %14, %cst_11 {dimension_numbers = #tpu.dot_dimension_numbers<[1], [0], [0], [1], [0, 0, 1, 1], [], []>} : vector<16x256xbf16>, vector<256x256xbf16>, vector<16x256xf32> -> vector<16x256xf32>
    %16 = arith.addf %12, %15 : vector<16x256xf32>
    %c0_12 = arith.constant 0 : index
    %c0_13 = arith.constant 0 : index
    %17 = vector.load %arg8[%c0_12, %c0_13] : memref<16x256xf32, #tpu.memory_space<vmem>>, vector<16x256xf32>
    tpu.vector_store %arg8[%c0_12, %c0_13], %16 {strides = array<i32>} : memref<16x256xf32, #tpu.memory_space<vmem>>, vector<16x256xf32>,
    %c0_i32_14 = arith.constant 0 : i32
    %18 = arith.cmpi eq, %arg1, %c0_i32_14 : i32
    %19 = arith.extui %18 : i1 to i32
    %c0_i32_15 = arith.constant 0 : i32
    %20 = arith.cmpi ne, %19, %c0_i32_15 : i32
    scf.if %20 {
      %c0_16 = arith.constant 0 : index
      %c0_17 = arith.constant 0 : index
      %21 = vector.load %arg8[%c0_16, %c0_17] : memref<16x256xf32, #tpu.memory_space<vmem>>, vector<16x256xf32>
      %c0_18 = arith.constant 0 : index
      %c0_19 = arith.constant 0 : index
      %22 = vector.load %arg6[%c0_18, %c0_19] : memref<1x256xbf16, #tpu.memory_space<vmem>>, vector<1x256xbf16>
      %23 = arith.extf %22 : vector<1x256xbf16> to vector<1x256xf32>
      %24 = vector.broadcast %23 : vector<1x256xf32> to vector<16x256xf32>
      %25 = arith.addf %21, %24 : vector<16x256xf32>
      %26 = arith.truncf %25 : vector<16x256xf32> to vector<16x256xbf16>
      %c0_20 = arith.constant 0 : index
      %c0_21 = arith.constant 0 : index
      %27 = vector.load %arg7[%c0_20, %c0_21] : memref<16x256xbf16, #tpu.memory_space<vmem>>, vector<16x256xbf16>
      tpu.vector_store %arg7[%c0_20, %c0_21], %26 {strides = array<i32>} : memref<16x256xbf16, #tpu.memory_space<vmem>>, vector<16x256xbf16>,
    } else {
    }
    return
  }
  func.func @transform_0(%arg0: i32, %arg1: i32) -> (i32, i32) {
    %c0_i32 = arith.constant 0 : i32
    %c0_i32_0 = arith.constant 0 : i32
    return %arg0, %c0_i32 : i32, i32
  }
  func.func @transform_1(%arg0: i32, %arg1: i32) -> (i32, i32) {
    %c0_i32 = arith.constant 0 : i32
    %c0_i32_0 = arith.constant 0 : i32
    return %c0_i32, %arg1 : i32, i32
  }
  func.func @transform_2(%arg0: i32, %arg1: i32) -> (i32, i32) {
    %c0_i32 = arith.constant 0 : i32
    %c0_i32_0 = arith.constant 0 : i32
    return %c0_i32, %arg1 : i32, i32
  }
  func.func @transform_3(%arg0: i32, %arg1: i32) -> (i32, i32) {
    %c0_i32 = arith.constant 0 : i32
    %c0_i32_0 = arith.constant 0 : i32
    return %arg1, %c0_i32 : i32, i32
  }
  func.func @transform_4(%arg0: i32, %arg1: i32) -> (i32, i32) {
    %c0_i32 = arith.constant 0 : i32
    %c0_i32_0 = arith.constant 0 : i32
    %c0_i32_1 = arith.constant 0 : i32
    return %c0_i32, %c0_i32_0 : i32, i32
  }
  func.func @transform_5(%arg0: i32, %arg1: i32) -> (i32, i32) {
    %c0_i32 = arith.constant 0 : i32
    %c0_i32_0 = arith.constant 0 : i32
    return %arg0, %c0_i32 : i32, i32
  }
}

</mosaic_0001>

<bundles_post_ra>
// kernel: tpu_custom_call.1
= control target key start
LH: loop header
LB: loop body
LE: loop exit
PB: predicated region body
PF: predicated region fallthrough
CT: control target
= control target key end

     0   :  { %10 = vsyncpa [#allocation4], 0  ;;  %s1033_s0 = inlined_call_operand.hbm [shape: bf16[16,256], index: 0, kind: input, shape index: {}]   ;;  %s1034_s1 = inlined_call_operand.hbm [shape: bf16[256,256], index: 1, kind: input, shape index: {}]   ;;  %s1035_s2 = inlined_call_operand.vmem [shape: bf16[1,256], index: 2, kind: input, shape index: {}]   ;;  %s1036_s3 = inlined_call_operand.hbm [shape: bf16[256,256], index: 3, kind: input, shape index: {}]   ;;  %s1037_s4 = inlined_call_operand.vmem [shape: bf16[1,256], index: 4, kind: input, shape index: {}]   ;;  %s1038_s5 = inlined_call_operand.hbm [shape: bf16[16,256], index: 5, kind: output, shape index: {}]  }
   0x1   :  { %11 = vsyncpa [#allocation7], 0 }
   0x2   :  { %12 = vsyncpa [#allocation5], 0  ;;  %s924_s18 = smov [#allocation6]   ;;  %s925_s20 = smov [#allocation3]  }
   0x3   :  { %s30_s19 = sshll.u32 %s924_s18, 4  ;;  %s18_s21 = sshll.u32 %s925_s20, 4  ;;  %s31_s19 = int_to_ptr.vmem [resolvable:$true] %s30_s19  ;;  %s960_s21 = int_to_ptr.vmem [resolvable:$true] %s18_s21 }
   0x4   :  { %s830_s24 = scalar_lea.hbm %s1034_s1, 4096 }
   0x5   :  { %p831_p0 = scmp.ne.s32.totalorder %s1034_s1, %s830_s24  ;;  %p834_p1 = scmp.lt.u32.totalorder %s830_s24, %s1034_s1 }
   0x7   :  { %p836_p2 = pnand %p834_p1, %p831_p0 }
   0x9   :  { %839 = shalt.err (!%p836_p2)
}
   0xa   :  { %s840_s29 = scalar_lea.vmem %s31_s19, 4096  ;;  %p845_p4 = scmp.lt.s32.totalorder %s31_s19, %s31_s19 }
   0xb   :  { %p841_p3 = scmp.ne.s32.totalorder %s31_s19, %s840_s29  ;;  %p846_p5 = scmp.lt.s32.totalorder %s840_s29, %s840_s29 }
   0xd   :  { %p847_p6 = por %p846_p5, %p845_p4 }
   0xf   :  { %p848_p7 = pnand %p847_p6, %p841_p3 }
  0x11   :  { %851 = shalt.err (!%p848_p7)
}
  0x12   :  { %s926_s30 = smov 128   ;;  %s927_s6 = smov 8  }
  0x13   :  { %36 = dma.hbm_to_vmem [thread:$0]  %s1034_s1, 4096, %s31_s19, [#allocation7], %s926_s30, %s926_s30, %s927_s6  }
  0x14   :  { %s852_s11 = scalar_lea.hbm %s1033_s0, 256 }
  0x15   :  { %p853_p8 = scmp.ne.s32.totalorder %s1033_s0, %s852_s11  ;;  %p856_p9 = scmp.lt.u32.totalorder %s852_s11, %s1033_s0 }
  0x17   :  { %p858_p10 = pnand %p856_p9, %p853_p8 }
  0x19   :  { %861 = shalt.err (!%p858_p10)
}
  0x1a   :  { %s862_s16 = scalar_lea.vmem %s960_s21, 256  ;;  %p867_p12 = scmp.lt.s32.totalorder %s960_s21, %s960_s21 }
  0x1b   :  { %p863_p11 = scmp.ne.s32.totalorder %s960_s21, %s862_s16  ;;  %p868_p13 = scmp.lt.s32.totalorder %s862_s16, %s862_s16 }
  0x1d   :  { %p869_p0 = por %p868_p13, %p867_p12 }
  0x1f   :  { %p870_p1 = pnand %p869_p0, %p863_p11 }
  0x21   :  { %873 = shalt.err (!%p870_p1)
}
  0x22   :  { %24 = dma.hbm_to_vmem [thread:$0]  %s1033_s0, 256, %s960_s21, [#allocation4], %s926_s30, %s926_s30, %s927_s6  }
  0x23   :  { %s928_s18 = smov [#allocation8]   ;;  %s874_s23 = scalar_lea.hbm %s1036_s3, 4096 }
  0x24   :  { %s44_s19 = sshll.u32 %s928_s18, 4  ;;  %p875_p2 = scmp.ne.s32.totalorder %s1036_s3, %s874_s23  ;;  %s45_s19 = int_to_ptr.vmem [resolvable:$true] %s44_s19 }
  0x25   :  { %p878_p3 = scmp.lt.u32.totalorder %s874_s23, %s1036_s3 }
  0x27   :  { %p880_p4 = pnand %p878_p3, %p875_p2 }
  0x29   :  { %883 = shalt.err (!%p880_p4)
}
  0x2a   :  { %s884_s28 = scalar_lea.vmem %s45_s19, 4096  ;;  %p889_p6 = scmp.lt.s32.totalorder %s45_s19, %s45_s19 }
  0x2b   :  { %p885_p5 = scmp.ne.s32.totalorder %s45_s19, %s884_s28  ;;  %p890_p7 = scmp.lt.s32.totalorder %s884_s28, %s884_s28 }
  0x2d   :  { %p891_p8 = por %p890_p7, %p889_p6 }
  0x2f   :  { %p892_p9 = pnand %p891_p8, %p885_p5 }
  0x31   :  { %895 = shalt.err (!%p892_p9)
}
  0x32   :  { %50 = dma.hbm_to_vmem [thread:$0]  %s1036_s3, 4096, %s45_s19, [#allocation7], %s926_s30, %s926_s30, %s927_s6  }
  0x33   :  { %918 = dma.done.wait [#allocation4], 256  }
  0x34   :  { %919 = vsyncadd [#allocation4], 4294967040 }
  0x35   :  { %920 = dma.done.wait [#allocation7], 8192  }
  0x36   :  { %921 = vsyncadd [#allocation7], 4294959104  ;;  %v731_v0 = vld [vmem:[#allocation6 + $0x4] ss:$8 sps:$4 sm:$0xff]   ;;  %v733_v1 = vld [vmem:[#allocation6] ss:$8 sps:$4 sm:$0xff]  }
  0x37   :  { %295 = vmatprep.subr.bf16.mxu0 %v731_v0  ;;  %v734_v2 = vld [vmem:[#allocation6 + $0x14] ss:$8 sps:$4 sm:$0xff]   ;;  %v736_v3 = vld [vmem:[#allocation6 + $0x10] ss:$8 sps:$4 sm:$0xff]   ;;  %v737_v4 = vld [vmem:[#allocation6 + $0x24] ss:$8 sps:$4 sm:$0xff]  }
  0x38   :  { %296 = vmatpush1.bf16.msra.mxu0 %v733_v1  ;;  %v739_v5 = vld [vmem:[#allocation6 + $0x20] ss:$8 sps:$4 sm:$0xff]   ;;  %v740_v6 = vld [vmem:[#allocation6 + $0x34] ss:$8 sps:$4 sm:$0xff]   ;;  %v742_v7 = vld [vmem:[#allocation6 + $0x30] ss:$8 sps:$4 sm:$0xff]  }
  0x39   :  { %297 = vmatprep.subr.bf16.mxu0 %v734_v2  ;;  %v743_v8 = vld [vmem:[#allocation6 + $0x44] ss:$8 sps:$4 sm:$0xff]   ;;  %v745_v9 = vld [vmem:[#allocation6 + $0x40] ss:$8 sps:$4 sm:$0xff]   ;;  %v746_v10 = vld [vmem:[#allocation6 + $0x54] ss:$8 sps:$4 sm:$0xff]   ;;  %v107_v2 = vlaneseq }
  0x3a   :  { %v748_v11 = vld [vmem:[#allocation6 + $0x50] ss:$8 sps:$4 sm:$0xff]   ;;  %v749_v12 = vld [vmem:[#allocation6 + $0x64] ss:$8 sps:$4 sm:$0xff]   ;;  %v751_v13 = vld [vmem:[#allocation6 + $0x60] ss:$8 sps:$4 sm:$0xff]  }
  0x3b   :  { %v752_v14 = vld [vmem:[#allocation6 + $0x74] ss:$8 sps:$4 sm:$0xff]   ;;  %v782_v16 = vld [vmem:[#allocation8 + $0x4] ss:$8 sps:$4 sm:$0xff]   ;;  %v784_v17 = vld [vmem:[#allocation8] ss:$8 sps:$4 sm:$0xff]  }
  0x3c   :  { %298 = vmatpush1.bf16.msra.mxu0 %v736_v3  ;;  %v781_v15 = vld [vmem:[#allocation3 + $0x4] ss:$8 sps:$4 sm:$0xff]   ;;  %540 = vmatprep.subr.bf16.mxu1 %v782_v16  ;;  %v787_v19 = vld [vmem:[#allocation8 + $0x10] ss:$8 sps:$4 sm:$0xff]   ;;  %v788_v21 = vld [vmem:[#allocation8 + $0x24] ss:$8 sps:$4 sm:$0xff]  }
  0x3d   :  { %299 = vmatprep.subr.bf16.mxu0 %v737_v4  ;;  %327 = vmatprep.mubr.bf16.mxu0 %v781_v15  ;;  %v785_v18 = vld [vmem:[#allocation8 + $0x14] ss:$8 sps:$4 sm:$0xff]   ;;  %v754_v20 = vld [vmem:[#allocation6 + $0x70] ss:$8 sps:$4 sm:$0xff]   ;;  %v755_v22 = vld [vmem:[#allocation6 + $0x84] ss:$8 sps:$4 sm:$0xff]  }
  0x3e   :  { %541 = vmatpush1.bf16.msra.mxu1 %v784_v17  ;;  %v790_v23 = vld [vmem:[#allocation8 + $0x20] ss:$8 sps:$4 sm:$0xff]   ;;  %v791_v25 = vld [vmem:[#allocation8 + $0x34] ss:$8 sps:$4 sm:$0xff]   ;;  %v793_v27 = vld [vmem:[#allocation8 + $0x30] ss:$8 sps:$4 sm:$0xff]  }
  0x3f   :  { %542 = vmatprep.subr.bf16.mxu1 %v785_v18  ;;  %v757_v24 = vld [vmem:[#allocation6 + $0x80] ss:$8 sps:$4 sm:$0xff]   ;;  %v758_v26 = vld [vmem:[#allocation6 + $0x94] ss:$8 sps:$4 sm:$0xff]   ;;  %v760_v28 = vld [vmem:[#allocation6 + $0x90] ss:$8 sps:$4 sm:$0xff]  }
  0x40   :  { %300 = vmatpush1.bf16.msra.mxu0 %v739_v5  ;;  %v794_v29 = vld [vmem:[#allocation8 + $0x44] ss:$8 sps:$4 sm:$0xff]   ;;  %v796_v31 = vld [vmem:[#allocation8 + $0x40] ss:$8 sps:$4 sm:$0xff]   ;;  %v797_v33 = vld [vmem:[#allocation8 + $0x54] ss:$8 sps:$4 sm:$0xff]  }
  0x41   :  { %301 = vmatprep.subr.bf16.mxu0 %v740_v6  ;;  %v761_v30 = vld [vmem:[#allocation6 + $0xa4] ss:$8 sps:$4 sm:$0xff]   ;;  %v763_v32 = vld [vmem:[#allocation6 + $0xa0] ss:$8 sps:$4 sm:$0xff]   ;;  %v764_v34 = vld [vmem:[#allocation6 + $0xb4] ss:$8 sps:$4 sm:$0xff]  }
  0x42   :  { %543 = vmatpush1.bf16.msra.mxu1 %v787_v19  ;;  %v799_v35 = vld [vmem:[#allocation8 + $0x50] ss:$8 sps:$4 sm:$0xff]   ;;  %v800_v37 = vld [vmem:[#allocation8 + $0x64] ss:$8 sps:$4 sm:$0xff]   ;;  %v802_v39 = vld [vmem:[#allocation8 + $0x60] ss:$8 sps:$4 sm:$0xff]  }
  0x43   :  { %544 = vmatprep.subr.bf16.mxu1 %v788_v21  ;;  %v766_v36 = vld [vmem:[#allocation6 + $0xb0] ss:$8 sps:$4 sm:$0xff]   ;;  %v767_v38 = vld [vmem:[#allocation6 + $0xc4] ss:$8 sps:$4 sm:$0xff]   ;;  %v769_v40 = vld [vmem:[#allocation6 + $0xc0] ss:$8 sps:$4 sm:$0xff]  }
  0x44   :  { %302 = vmatpush1.bf16.msra.mxu0 %v742_v7  ;;  %v803_v41 = vld [vmem:[#allocation8 + $0x74] ss:$8 sps:$4 sm:$0xff]   ;;  %v805_v43 = vld [vmem:[#allocation8 + $0x70] ss:$8 sps:$4 sm:$0xff]   ;;  %v806_v45 = vld [vmem:[#allocation8 + $0x84] ss:$8 sps:$4 sm:$0xff]  }
  0x45   :  { %303 = vmatprep.subr.bf16.mxu0 %v743_v8  ;;  %v770_v42 = vld [vmem:[#allocation6 + $0xd4] ss:$8 sps:$4 sm:$0xff]   ;;  %v772_v44 = vld [vmem:[#allocation6 + $0xd0] ss:$8 sps:$4 sm:$0xff]   ;;  %v773_v46 = vld [vmem:[#allocation6 + $0xe4] ss:$8 sps:$4 sm:$0xff]  }
  0x46   :  { %545 = vmatpush1.bf16.msra.mxu1 %v790_v23  ;;  %v808_v47 = vld [vmem:[#allocation8 + $0x80] ss:$8 sps:$4 sm:$0xff]   ;;  %v809_v49 = vld [vmem:[#allocation8 + $0x94] ss:$8 sps:$4 sm:$0xff]   ;;  %v811_v51 = vld [vmem:[#allocation8 + $0x90] ss:$8 sps:$4 sm:$0xff]  }
  0x47   :  { %546 = vmatprep.subr.bf16.mxu1 %v791_v25  ;;  %v775_v48 = vld [vmem:[#allocation6 + $0xe0] ss:$8 sps:$4 sm:$0xff]   ;;  %v776_v50 = vld [vmem:[#allocation6 + $0xf4] ss:$8 sps:$4 sm:$0xff]   ;;  %v778_v52 = vld [vmem:[#allocation6 + $0xf0] ss:$8 sps:$4 sm:$0xff]  }
  0x48   :  { %304 = vmatpush1.bf16.msra.mxu0 %v745_v9  ;;  %v812_v53 = vld [vmem:[#allocation8 + $0xa4] ss:$8 sps:$4 sm:$0xff]   ;;  %v779_v54 = vld [vmem:[#allocation3] ss:$8 sps:$4 sm:$0xff]   ;;  %v814_v55 = vld [vmem:[#allocation8 + $0xa0] ss:$8 sps:$4 sm:$0xff]  }
  0x49   :  { %305 = vmatprep.subr.bf16.mxu0 %v746_v10  ;;  %v815_v56 = vld [vmem:[#allocation8 + $0xb4] ss:$8 sps:$4 sm:$0xff]   ;;  %v817_v57 = vld [vmem:[#allocation8 + $0xb0] ss:$8 sps:$4 sm:$0xff]   ;;  %v818_v58 = vld [vmem:[#allocation8 + $0xc4] ss:$8 sps:$4 sm:$0xff]  }
  0x4a   :  { %547 = vmatpush1.bf16.msra.mxu1 %v793_v27  ;;  %v820_v59 = vld [vmem:[#allocation8 + $0xc0] ss:$8 sps:$4 sm:$0xff]   ;;  %v821_v60 = vld [vmem:[#allocation8 + $0xd4] ss:$8 sps:$4 sm:$0xff]   ;;  %v823_v61 = vld [vmem:[#allocation8 + $0xd0] ss:$8 sps:$4 sm:$0xff]  }
  0x4b   :  { %548 = vmatprep.subr.bf16.mxu1 %v794_v29  ;;  %v824_v62 = vld [vmem:[#allocation8 + $0xe4] ss:$8 sps:$4 sm:$0xff]   ;;  %v826_v63 = vld [vmem:[#allocation8 + $0xe0] ss:$8 sps:$4 sm:$0xff]   ;;  %v827_v0 = vld [vmem:[#allocation8 + $0xf4] ss:$8 sps:$4 sm:$0xff]  }
  0x4c   :  { %306 = vmatpush1.bf16.msra.mxu0 %v748_v11  ;;  %v829_v1 = vld [vmem:[#allocation8 + $0xf0] ss:$8 sps:$4 sm:$0xff]   ;;  %v108_v3 = vshrl.u32 %v107_v2, 7  ;;  %s929_s8 = smov [#allocation9]  }
  0x4d   :  { %307 = vmatprep.subr.bf16.mxu0 %v749_v12  ;;  %v104_v4 = vld [vmem:[%s1035_s2] sm:$0x3]  ;;  %s642_s9 = sshll.u32 %s929_s8, 4  ;;  %s643_s9 = int_to_ptr.vmem [resolvable:$true] %s642_s9 }
  0x4e   :  { %549 = vmatpush1.bf16.msra.mxu1 %v796_v31  ;;  %v105_v5 = vunpack.c.l.bf16 %v104_v4  ;;  %v109_v6 = vsub.s32 0, %v108_v3  ;;  %v113_v7 = vsub.s32 2, %v108_v3  ;;  %p901_p11 = scmp.lt.s32.totalorder %s643_s9, %s643_s9 }
  0x4f   :  { %550 = vmatprep.subr.bf16.mxu1 %v797_v33 }
  0x50   :  { %308 = vmatpush1.bf16.msra.mxu0 %v751_v13  ;;  %v110_v8 = vrot.slane %v105_v5, %v109_v6  ;;  %v114_v9 = vrot.slane %v105_v5, %v113_v7 }
  0x51   :  { %309 = vmatprep.subr.bf16.mxu0 %v752_v14 }
  0x52   :  { %551 = vmatpush1.bf16.msra.mxu1 %v799_v35  ;;  %v120_v10 = vrot.slane %v110_v8, %v109_v6  ;;  %v124_v11 = vrot.slane %v114_v9, %v109_v6 }
  0x53   :  { %552 = vmatprep.subr.bf16.mxu1 %v800_v37 }
  0x54   :  { %310 = vmatpush1.bf16.msra.mxu0 %v754_v20 }
  0x55   :  { %311 = vmatprep.subr.bf16.mxu0 %v755_v22 }
  0x56   :  { %553 = vmatpush1.bf16.msra.mxu1 %v802_v39 }
  0x57   :  { %554 = vmatprep.subr.bf16.mxu1 %v803_v41 }
  0x58   :  { %312 = vmatpush1.bf16.msra.mxu0 %v757_v24 }
  0x59   :  { %313 = vmatprep.subr.bf16.mxu0 %v758_v26  ;;  %v598_v26 = vld [vmem:[%s1037_s4] sm:$0x3]  ;;  %s896_s4 = scalar_lea.vmem %s643_s9, 256 }
  0x5a   :  { %555 = vmatpush1.bf16.msra.mxu1 %v805_v43  ;;  %v599_v27 = vunpack.c.l.bf16 %v598_v26  ;;  %p897_p10 = scmp.ne.s32.totalorder %s643_s9, %s896_s4  ;;  %p902_p12 = scmp.lt.s32.totalorder %s896_s4, %s896_s4 }
  0x5b   :  { %556 = vmatprep.subr.bf16.mxu1 %v806_v45 }
  0x5c   :  { %314 = vmatpush1.bf16.msra.mxu0 %v760_v28  ;;  %v604_v28 = vrot.slane %v599_v27, %v109_v6  ;;  %v608_v29 = vrot.slane %v599_v27, %v113_v7  ;;  %p903_p13 = por %p902_p12, %p901_p11 }
  0x5d   :  { %315 = vmatprep.subr.bf16.mxu0 %v761_v30 }
  0x5e   :  { %557 = vmatpush1.bf16.msra.mxu1 %v808_v47  ;;  %v614_v30 = vrot.slane %v604_v28, %v109_v6  ;;  %v618_v31 = vrot.slane %v608_v29, %v109_v6  ;;  %p904_p0 = pnand %p903_p13, %p897_p10 }
  0x5f   :  { %558 = vmatprep.subr.bf16.mxu1 %v809_v49 }
  0x60   :  { %316 = vmatpush1.bf16.msra.mxu0 %v763_v32 }
  0x61   :  { %317 = vmatprep.subr.bf16.mxu0 %v764_v34 }
  0x62   :  { %559 = vmatpush1.bf16.msra.mxu1 %v811_v51 }
  0x63   :  { %560 = vmatprep.subr.bf16.mxu1 %v812_v53 }
  0x64   :  { %318 = vmatpush1.bf16.msra.mxu0 %v766_v36 }
  0x65   :  { %319 = vmatprep.subr.bf16.mxu0 %v767_v38 }
  0x66   :  { %561 = vmatpush1.bf16.msra.mxu1 %v814_v55 }
  0x67   :  { %562 = vmatprep.subr.bf16.mxu1 %v815_v56 }
  0x68   :  { %320 = vmatpush1.bf16.msra.mxu0 %v769_v40 }
  0x69   :  { %321 = vmatprep.subr.bf16.mxu0 %v770_v42 }
  0x6a   :  { %563 = vmatpush1.bf16.msra.mxu1 %v817_v57 }
  0x6b   :  { %564 = vmatprep.subr.bf16.mxu1 %v818_v58 }
  0x6c   :  { %322 = vmatpush1.bf16.msra.mxu0 %v772_v44 }
  0x6d   :  { %323 = vmatprep.subr.bf16.mxu0 %v773_v46 }
  0x6e   :  { %565 = vmatpush1.bf16.msra.mxu1 %v820_v59 }
  0x6f   :  { %566 = vmatprep.subr.bf16.mxu1 %v821_v60 }
  0x70   :  { %324 = vmatpush1.bf16.msra.mxu0 %v775_v48 }
  0x71   :  { %325 = vmatprep.subr.bf16.mxu0 %v776_v50 }
  0x72   :  { %567 = vmatpush1.bf16.msra.mxu1 %v823_v61 }
  0x73   :  { %568 = vmatprep.subr.bf16.mxu1 %v824_v62 }
  0x74   :  { %326 = vmatpush1.bf16.msra.mxu0 %v778_v52 }
  0x76   :  { %569 = vmatpush1.bf16.msra.mxu1 %v826_v63 }
  0x77   :  { %328 = vmatmul.mubr.bf16.vlgmr.msra.gmra.mrb[0].mxu0 %v779_v54  ;;  %570 = vmatprep.subr.bf16.mxu1 %v827_v0 }
  0x7a   :  { %571 = vmatpush1.bf16.msra.mxu1 %v829_v1 }
 0x14a   :  { %v329_v12 = vpop.f32.mrb[0].mxu0 }
 0x14b   :  { %v330_v13 = vadd.f32 %v329_v12, %v120_v10  ;;  %v331_v14 = vpop.f32.mrb[1].mxu0 }
 0x14c   :  { %v332_v15 = vadd.f32 %v331_v14, %v124_v11  ;;  %v333_v16 = vpop.f32.mrb[2].mxu0 }
 0x14d   :  { %v334_v17 = vadd.f32 %v333_v16, %v120_v10  ;;  %v335_v18 = vpop.f32.mrb[3].mxu0  ;;  %v338_v20 = vmax.f32 %v330_v13, 0.0 }
 0x14e   :  { %v336_v19 = vadd.f32 %v335_v18, %v124_v11  ;;  %v339_v22 = vmax.f32 %v332_v15, 0.0 }
 0x14f   :  { %v340_v21 = vmax.f32 %v334_v17, 0.0 }
 0x150   :  { %v341_v23 = vmax.f32 %v336_v19, 0.0 }
 0x151   :  { %v346_v24 = vpack.c.bf16 %v340_v21, %v338_v20 }
 0x152   :  { %v347_v25 = vpack.c.bf16 %v341_v23, %v339_v22 }
 0x154   :  { %572 = vmatprep.mubr.bf16.mxu1 %v347_v25 }
 0x155   :  { %573 = vmatmul.mubr.bf16.vlgmr.msra.gmra.mrb[0].mxu1 %v346_v24 }
 0x228   :  { %v574_v32 = vpop.f32.mrb[0].mxu1 }
 0x229   :  { %v619_v33 = vadd.f32 %v614_v30, %v574_v32  ;;  %v576_v34 = vpop.f32.mrb[1].mxu1 }
 0x22a   :  { %v620_v35 = vadd.f32 %v618_v31, %v576_v34  ;;  %v578_v36 = vpop.f32.mrb[2].mxu1 }
 0x22b   :  { %v621_v37 = vadd.f32 %v614_v30, %v578_v36  ;;  %v580_v38 = vpop.f32.mrb[3].mxu1 }
 0x22c   :  { %v723_v39 = vpack.c.bf16 %v620_v35, %v619_v33  ;;  %v622_v40 = vadd.f32 %v618_v31, %v580_v38 }
 0x22e   :  { %635 = vst [vmem:[#allocation9] sm:$0xff] %v723_v39  ;;  %v724_v41 = vpack.c.bf16 %v622_v40, %v621_v37 }
 0x230   :  { %636 = vst [vmem:[#allocation9 + $0x8] sm:$0xff] %v724_v41 }
 0x231   :  { %907 = shalt.err (!%p904_p0)
}
 0x232   :  { %s908_s12 = scalar_lea.hbm %s1038_s5, 256 }
 0x233   :  { %p909_p1 = scmp.ne.s32.totalorder %s1038_s5, %s908_s12  ;;  %p912_p2 = scmp.lt.u32.totalorder %s908_s12, %s1038_s5 }
 0x235   :  { %p914_p3 = pnand %p912_p2, %p909_p1 }
 0x237   :  { %917 = shalt.err (!%p914_p3)
}
 0x238   :  { %648 = dma.vmem_to_hbm [thread:$0]  %s643_s9, 256, %s1038_s5, [#allocation5], %s926_s30, %s926_s30, %s927_s6  }
 0x239   :  { %922 = dma.done.wait [#allocation5], 256  }
 0x23a   :  { %923 = vsyncadd [#allocation5], 4294967040 }
 0x23b   :  { %652 = vsyncpa [#allocation4], 1 }
 0x23c   :  { %653 = vsyncpa [#allocation7], 1 }
 0x23d   :  { %654 = vsyncpa [#allocation5], 1 }

</bundles_post_ra>
